<compile_context>
chip_gen: v7x
topology: tpu7x:2x2x1
jax: 0.10.0
libtpu: 0.0.40
codegen_flags: <defaults>
</compile_context>

<pallas_src>
import functools

import jax
import jax.numpy as jnp
from jax.experimental import pallas as pl
from jax.experimental.pallas import tpu as pltpu


def _distill_kl_kernel(in_ref, tgt_ref, row_ref, *, inv_temp):
    # Upcast to f32 for the math regardless of HBM dtype.
    o = in_ref[...].astype(jnp.float32) * inv_temp      # [tile, C_pad]
    t = tgt_ref[...].astype(jnp.float32) * inv_temp     # [tile, C_pad]

    # Student log-softmax pieces.
    o_shift = o - jnp.max(o, axis=1, keepdims=True)
    lse_o = jnp.log(jnp.sum(jnp.exp(o_shift), axis=1, keepdims=True))   # [tile, 1]

    # Teacher softmax pieces (unnormalized).
    t_shift = t - jnp.max(t, axis=1, keepdims=True)
    t_exp = jnp.exp(t_shift)                                            # 0 on pad cols
    z_t = jnp.sum(t_exp, axis=1, keepdims=True)                         # [tile, 1]

    # Per-row KL(q || p) = sum_c q*(log q - log p)
    #                    = (sum_c t_exp*(t_shift - o_shift)) / Z_t + lse_o - log(Z_t)
    # (uses sum_c q = 1; pad columns contribute exactly 0 since t_exp == 0 there).
    s = jnp.sum(t_exp * (t_shift - o_shift), axis=1, keepdims=True)     # [tile, 1]
    row_ref[...] = s / z_t + lse_o - jnp.log(z_t)


def _round_up(x, m):
    return (x + m - 1) // m * m


def distill_kl(inputs, targets, temp=4.0, *, max_batch_tile=1024,
               vmem_budget_bytes=32 * 1024 * 1024):
    """sum(softmax(t/T) * (log_softmax(t/T) - log_softmax(i/T))) * T^2 / N"""
    assert inputs.shape == targets.shape and inputs.ndim == 2
    n, c = inputs.shape

    # Lane-dense class axis.
    c_pad = _round_up(c, 128)

    # Batch tile: largest multiple of 8 such that 2 inputs x 2 pipeline buffers of
    # (tile, c_pad) fit the VMEM budget (budget chosen to be safe on v7x's 64 MiB).
    itemsize = jnp.dtype(inputs.dtype).itemsize
    bytes_per_row = 4 * c_pad * itemsize            # 2 inputs x 2 buffers
    tile = max(8, min(max_batch_tile, (vmem_budget_bytes // bytes_per_row) // 8 * 8))
    tile = min(tile, _round_up(n, 8))
    n_pad = _round_up(n, tile)

    # Pad: columns with a finite very-negative value (exp underflows to exactly 0,
    # products with it stay finite); extra rows produce KL == 0 and are sliced off.
    pad_val = -1e30
    if (n_pad, c_pad) != (n, c):
        pad_cfg = ((0, n_pad - n), (0, c_pad - c))
        inputs_p = jnp.pad(inputs, pad_cfg, constant_values=pad_val)
        targets_p = jnp.pad(targets, pad_cfg, constant_values=pad_val)
    else:
        inputs_p, targets_p = inputs, targets

    kernel = functools.partial(_distill_kl_kernel, inv_temp=1.0 / float(temp))

    rows = pl.pallas_call(
        kernel,
        out_shape=jax.ShapeDtypeStruct((n_pad, 1), jnp.float32),
        grid_spec=pltpu.PrefetchScalarGridSpec(
            num_scalar_prefetch=0,
            grid=(n_pad // tile,),
            in_specs=[
                pl.BlockSpec((tile, c_pad), lambda i: (i, 0)),
                pl.BlockSpec((tile, c_pad), lambda i: (i, 0)),
            ],
            out_specs=pl.BlockSpec((tile, 1), lambda i: (i, 0)),
        ),
        compiler_params=pltpu.CompilerParams(
            dimension_semantics=("parallel",),          # megacore on v7x
            vmem_limit_bytes=48 * 1024 * 1024,
        ),
    )(inputs_p, targets_p)

    # Tiny epilogue in the wrapper: drop padded rows, sum, scale.
    kl_sum = jnp.sum(rows[:n, 0])
    return kl_sum * jnp.float32(temp) ** 2 / jnp.float32(n)


def _reference(inputs, targets, temp):
    log_p = jax.nn.log_softmax(inputs / temp, axis=1)
    q = jax.nn.softmax(targets / temp, axis=1)
    kl_sum = jnp.sum(q * (jnp.log(q) - log_p))          # KLDivLoss(reduction='sum')
    return kl_sum * temp ** 2 / inputs.shape[0]


if __name__ == "__main__":
    key = jax.random.PRNGKey(0)
    k1, k2 = jax.random.split(key)

    # Small shapes; non-multiples of 8 / 128 to exercise the padding paths.
    N, C = 18, 100
    temperature = 4.0

    inputs = jax.random.normal(k1, (N, C), dtype=jnp.float32) * 3.0
    targets = jax.random.normal(k2, (N, C), dtype=jnp.float32) * 3.0

    loss = distill_kl(inputs, targets, temp=temperature)
    jax.block_until_ready(loss)

    ref = _reference(inputs, targets, temperature)
    assert jnp.allclose(loss, ref, rtol=1e-4, atol=1e-4), (loss, ref)

    print("KERNEL_OK")
</pallas_src>

<mosaic_0001>
module attributes {stable_mosaic.version = 11 : i64} {
  func.func @_distill_kl_kernel(%arg0: i32, %arg1: memref<24x128xf32, #tpu.memory_space<vmem>>, %arg2: memref<24x128xf32, #tpu.memory_space<vmem>>, %arg3: memref<24x1xf32, #tpu.memory_space<vmem>>) attributes {dimension_semantics = [#tpu.dimension_semantics<parallel>], iteration_bounds = array<i64: 1>, scalar_prefetch = 0 : i64, scratch_operands = 0 : i64, tpu.core_type = #tpu.core_type<tc>, window_params = [{transform_indices = @transform_0, window_bounds = array<i64: 24, 128>}, {transform_indices = @transform_1, window_bounds = array<i64: 24, 128>}, {transform_indices = @transform_2, window_bounds = array<i64: 24, 1>}]} {
    %c0 = arith.constant 0 : index
    %c0_0 = arith.constant 0 : index
    %0 = vector.load %arg1[%c0, %c0_0] : memref<24x128xf32, #tpu.memory_space<vmem>>, vector<24x128xf32>
    %cst = arith.constant 2.500000e-01 : f32
    %1 = vector.broadcast %cst : f32 to vector<24x128xf32>
    %2 = arith.mulf %0, %1 : vector<24x128xf32>
    %c0_1 = arith.constant 0 : index
    %c0_2 = arith.constant 0 : index
    %3 = vector.load %arg2[%c0_1, %c0_2] : memref<24x128xf32, #tpu.memory_space<vmem>>, vector<24x128xf32>
    %cst_3 = arith.constant 2.500000e-01 : f32
    %4 = vector.broadcast %cst_3 : f32 to vector<24x128xf32>
    %5 = arith.mulf %3, %4 : vector<24x128xf32>
    %cst_4 = arith.constant dense<0xFF800000> : vector<24xf32>
    %6 = vector.multi_reduction <maximumf>, %2, %cst_4 [1] : vector<24x128xf32> to vector<24xf32>
    %7 = vector.shape_cast %6 : vector<24xf32> to vector<24x1xf32>
    %8 = vector.broadcast %7 : vector<24x1xf32> to vector<24x128xf32>
    %9 = arith.subf %2, %8 : vector<24x128xf32>
    %10 = math.exp %9 : vector<24x128xf32>
    %cst_5 = arith.constant dense<0.000000e+00> : vector<24xf32>
    %11 = vector.multi_reduction <add>, %10, %cst_5 [1] : vector<24x128xf32> to vector<24xf32>
    %12 = vector.shape_cast %11 : vector<24xf32> to vector<24x1xf32>
    %13 = math.log %12 : vector<24x1xf32>
    %cst_6 = arith.constant dense<0xFF800000> : vector<24xf32>
    %14 = vector.multi_reduction <maximumf>, %5, %cst_6 [1] : vector<24x128xf32> to vector<24xf32>
    %15 = vector.shape_cast %14 : vector<24xf32> to vector<24x1xf32>
    %16 = vector.broadcast %15 : vector<24x1xf32> to vector<24x128xf32>
    %17 = arith.subf %5, %16 : vector<24x128xf32>
    %18 = math.exp %17 : vector<24x128xf32>
    %cst_7 = arith.constant dense<0.000000e+00> : vector<24xf32>
    %19 = vector.multi_reduction <add>, %18, %cst_7 [1] : vector<24x128xf32> to vector<24xf32>
    %20 = vector.shape_cast %19 : vector<24xf32> to vector<24x1xf32>
    %21 = arith.subf %17, %9 : vector<24x128xf32>
    %22 = arith.mulf %18, %21 : vector<24x128xf32>
    %cst_8 = arith.constant dense<0.000000e+00> : vector<24xf32>
    %23 = vector.multi_reduction <add>, %22, %cst_8 [1] : vector<24x128xf32> to vector<24xf32>
    %24 = vector.shape_cast %23 : vector<24xf32> to vector<24x1xf32>
    %25 = arith.divf %24, %20 : vector<24x1xf32>
    %26 = arith.addf %25, %13 : vector<24x1xf32>
    %27 = math.log %20 : vector<24x1xf32>
    %28 = arith.subf %26, %27 : vector<24x1xf32>
    %c0_9 = arith.constant 0 : index
    %c0_10 = arith.constant 0 : index
    %29 = vector.load %arg3[%c0_9, %c0_10] : memref<24x1xf32, #tpu.memory_space<vmem>>, vector<24x1xf32>
    tpu.vector_store %arg3[%c0_9, %c0_10], %28 {strides = array<i32>} : memref<24x1xf32, #tpu.memory_space<vmem>>, vector<24x1xf32>,
    return
  }
  func.func @transform_0(%arg0: i32) -> (i32, i32) {
    %c0_i32 = arith.constant 0 : i32
    %c0_i32_0 = arith.constant 0 : i32
    return %arg0, %c0_i32 : i32, i32
  }
  func.func @transform_1(%arg0: i32) -> (i32, i32) {
    %c0_i32 = arith.constant 0 : i32
    %c0_i32_0 = arith.constant 0 : i32
    return %arg0, %c0_i32 : i32, i32
  }
  func.func @transform_2(%arg0: i32) -> (i32, i32) {
    %c0_i32 = arith.constant 0 : i32
    %c0_i32_0 = arith.constant 0 : i32
    return %arg0, %c0_i32 : i32, i32
  }
}

</mosaic_0001>

<bundles_post_ra>
// kernel: tpu_custom_call.1
= control target key start
LH: loop header
LB: loop body
LE: loop exit
PB: predicated region body
PF: predicated region fallthrough
CT: control target
= control target key end

     0   :  { %7 = vsyncpa [#allocation3], 0  ;;  %s273_s0 = inlined_call_operand.hbm [shape: f32[24,128], index: 0, kind: input, shape index: {}]   ;;  %s274_s1 = inlined_call_operand.hbm [shape: f32[24,128], index: 1, kind: input, shape index: {}]   ;;  %s275_s2 = inlined_call_operand.vmem [shape: f32[24,1], index: 2, kind: output, shape index: {}]  }
   0x1   :  { %8 = vsyncpa [#allocation5], 0  ;;  %s221_s9 = smov [#allocation2]   ;;  %s173_s13 = scalar_lea.hbm %s273_s0, 384 }
   0x2   :  { %s14_s10 = sshll.u32 %s221_s9, 4  ;;  %p174_p0 = scmp.ne.s32.totalorder %s273_s0, %s173_s13  ;;  %s15_s10 = int_to_ptr.vmem [resolvable:$true] %s14_s10 }
   0x3   :  { %p177_p1 = scmp.lt.u32.totalorder %s173_s13, %s273_s0 }
   0x5   :  { %p179_p2 = pnand %p177_p1, %p174_p0 }
   0x7   :  { %182 = shalt.err (!%p179_p2)
}
   0x8   :  { %s183_s18 = scalar_lea.vmem %s15_s10, 384  ;;  %p188_p4 = scmp.lt.s32.totalorder %s15_s10, %s15_s10 }
   0x9   :  { %p184_p3 = scmp.ne.s32.totalorder %s15_s10, %s183_s18  ;;  %p189_p5 = scmp.lt.s32.totalorder %s183_s18, %s183_s18 }
   0xb   :  { %p190_p6 = por %p189_p5, %p188_p4 }
   0xd   :  { %p191_p7 = pnand %p190_p6, %p184_p3 }
   0xf   :  { %194 = shalt.err (!%p191_p7)
}
  0x10   :  { %s222_s19 = smov 128   ;;  %s223_s20 = smov 8  }
  0x11   :  { %20 = dma.hbm_to_vmem [thread:$0]  %s273_s0, 384, %s15_s10, [#allocation3], %s222_s19, %s222_s19, %s223_s20  }
  0x12   :  { %s224_s23 = smov [#allocation4]   ;;  %s195_s27 = scalar_lea.hbm %s274_s1, 384 }
  0x13   :  { %s26_s24 = sshll.u32 %s224_s23, 4  ;;  %p196_p8 = scmp.ne.s32.totalorder %s274_s1, %s195_s27  ;;  %s27_s24 = int_to_ptr.vmem [resolvable:$true] %s26_s24 }
  0x14   :  { %p199_p9 = scmp.lt.u32.totalorder %s195_s27, %s274_s1 }
  0x16   :  { %p201_p10 = pnand %p199_p9, %p196_p8 }
  0x18   :  { %204 = shalt.err (!%p201_p10)
}
  0x19   :  { %s205_s4 = scalar_lea.vmem %s27_s24, 384  ;;  %p210_p12 = scmp.lt.s32.totalorder %s27_s24, %s27_s24 }
  0x1a   :  { %p206_p11 = scmp.ne.s32.totalorder %s27_s24, %s205_s4  ;;  %p211_p13 = scmp.lt.s32.totalorder %s205_s4, %s205_s4 }
  0x1c   :  { %p212_p0 = por %p211_p13, %p210_p12 }
  0x1e   :  { %p213_p1 = pnand %p212_p0, %p206_p11 }
  0x20   :  { %216 = shalt.err (!%p213_p1)
}
  0x21   :  { %32 = dma.hbm_to_vmem [thread:$0]  %s274_s1, 384, %s27_s24, [#allocation5], %s222_s19, %s222_s19, %s223_s20  }
  0x22   :  { %217 = dma.done.wait [#allocation3], 384  }
  0x23   :  { %218 = vsyncadd [#allocation3], 4294966912 }
  0x24   :  { %219 = dma.done.wait [#allocation5], 384  }
  0x25   :  { %220 = vsyncadd [#allocation5], 4294966912  ;;  %v41_v0 = vld [vmem:[#allocation2 + $0x10] sm:$0xff]  ;;  %v39_v1 = vld [vmem:[#allocation2] sm:$0xff]  ;;  %vm129_vm0 = vcmask 7168  }
  0x26   :  { %v45_v2 = vld [vmem:[#allocation4] sm:$0xff]  ;;  %v44_v3 = vmul.f32 0.25, %v41_v0  ;;  %v42_v4 = vmul.f32 0.25, %v39_v1  ;;  %v40_v5 = vld [vmem:[#allocation2 + $0x8] sm:$0xff]  ;;  %v46_v9 = vld [vmem:[#allocation4 + $0x8] sm:$0xff] }
  0x27   :  { %v48_v6 = vmul.f32 0.25, %v45_v2  ;;  %v43_v7 = vmul.f32 0.25, %v40_v5  ;;  %v47_v8 = vld [vmem:[#allocation4 + $0x10] sm:$0xff]  ;;  %v49_v11 = vmul.f32 0.25, %v46_v9 }
  0x28   :  { %55 = vmax.xlane.f32.xlu1 %v44_v3  ;;  %51 = vmax.xlane.f32.xlu0 %v42_v4  ;;  %v50_v10 = vmul.f32 0.25, %v47_v8 }
  0x2c   :  { %78 = vmax.xlane.f32.xlu1 %v48_v6  ;;  %53 = vmax.xlane.f32.xlu0 %v43_v7 }
  0x30   :  { %82 = vmax.xlane.f32.xlu1 %v50_v10  ;;  %80 = vmax.xlane.f32.xlu0 %v49_v11 }
  0xb5   :  { %v56_v12 = vpop.xlane.xlu1 %55  ;;  %v52_v13 = vpop.xlane.xlu0 %51 }
  0xb6   :  { %v59_v14 = vsub.f32 %v44_v3, %v56_v12  ;;  %v57_v15 = vsub.f32 %v42_v4, %v52_v13 }
  0xb8   :  { %v60_v16 = vmul.f32 1.442695, %v57_v15  ;;  %v64_v17 = vmul.f32 1.442695, %v59_v14 }
  0xb9   :  { %v79_v18 = vpop.xlane.xlu1 %78  ;;  %v54_v19 = vpop.xlane.xlu0 %53 }
  0xba   :  { %v84_v20 = vsub.f32 %v48_v6, %v79_v18  ;;  %v58_v21 = vsub.f32 %v43_v7, %v54_v19  ;;  %143 = vpow2.f32 %v60_v16 }
  0xbb   :  { %145 = vpow2.f32 %v64_v17 }
  0xbc   :  { %v62_v22 = vmul.f32 1.442695, %v58_v21  ;;  %v87_v25 = vmul.f32 1.442695, %v84_v20  ;;  %v99_v35 = vsub.f32 %v84_v20, %v57_v15 }
  0xbd   :  { %v83_v23 = vpop.xlane.xlu1 %82  ;;  %v81_v24 = vpop.xlane.xlu0 %80 }
  0xbe   :  { %v85_v26 = vsub.f32 %v49_v11, %v81_v24  ;;  %147 = vpow2.f32 %v62_v22  ;;  %v86_v27 = vsub.f32 %v50_v10, %v83_v23 }
  0xbf   :  { %149 = vpow2.f32 %v87_v25 }
  0xc0   :  { %v89_v28 = vmul.f32 1.442695, %v85_v26  ;;  %v91_v29 = vmul.f32 1.442695, %v86_v27  ;;  %v101_v38 = vsub.f32 %v86_v27, %v59_v14  ;;  %v100_v39 = vsub.f32 %v85_v26, %v58_v21 }
  0xc2   :  { %151 = vpow2.f32 %v89_v28 }
  0xc3   :  { %153 = vpow2.f32 %v91_v29 }
  0xc4   :  { %v144_v30 = vpop.eup %143 }
  0xc5   :  { %66 = vadd.xlane.f32.xlu0 %v144_v30  ;;  %v146_v31 = vpop.eup %145 }
  0xc8   :  { %v148_v32 = vpop.eup %147 }
  0xc9   :  { %70 = vadd.xlane.f32.xlu0 %v146_v31  ;;  %68 = vadd.xlane.f32.xlu1 %v148_v32  ;;  %v150_v33 = vpop.eup %149 }
  0xca   :  { %v102_v36 = vmul.f32 %v150_v33, %v99_v35 }
  0xcc   :  { %v152_v34 = vpop.eup %151 }
  0xcd   :  { %93 = vadd.xlane.f32.xlu1 %v150_v33  ;;  %95 = vadd.xlane.f32.xlu0 %v152_v34  ;;  %v154_v37 = vpop.eup %153  ;;  %v103_v41 = vmul.f32 %v152_v34, %v100_v39 }
  0xce   :  { %v104_v40 = vmul.f32 %v154_v37, %v101_v38 }
  0xd1   :  { %97 = vadd.xlane.f32.xlu1 %v154_v37  ;;  %105 = vadd.xlane.f32.xlu0 %v102_v36 }
  0xd5   :  { %109 = vadd.xlane.f32.xlu0 %v104_v40  ;;  %107 = vadd.xlane.f32.xlu1 %v103_v41 }
 0x152   :  { %v67_v42 = vpop.xlane.xlu0 %66 }
 0x153   :  { %155 = vlog2.f32 %v67_v42 }
 0x156   :  { %v69_v43 = vpop.xlane.xlu1 %68  ;;  %v71_v44 = vpop.xlane.xlu0 %70 }
 0x157   :  { %157 = vlog2.f32 %v69_v43 }
 0x158   :  { %159 = vlog2.f32 %v71_v44 }
 0x15a   :  { %v94_v45 = vpop.xlane.xlu1 %93  ;;  %v96_v46 = vpop.xlane.xlu0 %95 }
 0x15b   :  { %161 = vrcp.f32 %v94_v45 }
 0x15c   :  { %163 = vlog2.f32 %v94_v45 }
 0x15d   :  { %165 = vrcp.f32 %v96_v46  ;;  %v156_v48 = vpop.eup %155 }
 0x15e   :  { %167 = vlog2.f32 %v96_v46  ;;  %v98_v47 = vpop.xlane.xlu1 %97  ;;  %v106_v50 = vpop.xlane.xlu0 %105  ;;  %v73_v54 = vmul.f32 0.6931472, %v156_v48 }
 0x15f   :  { %169 = vrcp.f32 %v98_v47 }
 0x160   :  { %171 = vlog2.f32 %v98_v47 }
 0x161   :  { %v158_v49 = vpop.eup %157 }
 0x162   :  { %v160_v51 = vpop.eup %159  ;;  %v108_v57 = vpop.xlane.xlu1 %107  ;;  %v75_v59 = vmul.f32 0.6931472, %v158_v49 }
 0x163   :  { %v110_v1 = vpop.xlane.xlu0 %109  ;;  %v77_v3 = vmul.f32 0.6931472, %v160_v51 }
 0x165   :  { %v162_v52 = vpop.eup %161 }
 0x166   :  { %v164_v53 = vpop.eup %163  ;;  %v112_v55 = vmul.f32 %v162_v52, %v106_v50 }
 0x167   :  { %v166_v56 = vpop.eup %165  ;;  %v121_v60 = vmul.f32 0.6931472, %v164_v53 }
 0x168   :  { %v168_v58 = vpop.eup %167  ;;  %v117_v61 = vadd.f32 %v112_v55, %v73_v54  ;;  %v114_v62 = vmul.f32 %v166_v56, %v108_v57 }
 0x169   :  { %v170_v63 = vpop.eup %169  ;;  %v123_v0 = vmul.f32 0.6931472, %v168_v58 }
 0x16a   :  { %v172_v2 = vpop.eup %171  ;;  %v126_v4 = vsub.f32 %v117_v61, %v121_v60  ;;  %v118_v5 = vadd.f32 %v114_v62, %v75_v59  ;;  %v116_v6 = vmul.f32 %v170_v63, %v110_v1 }
 0x16b   :  { %v125_v7 = vmul.f32 0.6931472, %v172_v2 }
 0x16c   :  { %130 = vst.msk [vmem:[%s275_s2] sm:$0xff] %vm129_vm0, %v126_v4  ;;  %v127_v8 = vsub.f32 %v118_v5, %v123_v0  ;;  %v119_v9 = vadd.f32 %v116_v6, %v77_v3 }
 0x16e   :  { %131 = vst.msk [vmem:[%s275_s2 + $0x8] sm:$0xff] %vm129_vm0, %v127_v8  ;;  %v128_v10 = vsub.f32 %v119_v9, %v125_v7 }
 0x170   :  { %132 = vst.msk [vmem:[%s275_s2 + $0x10] sm:$0xff] %vm129_vm0, %v128_v10 }
 0x171   :  { %137 = vsyncpa [#allocation3], 1 }
 0x172   :  { %138 = vsyncpa [#allocation5], 1 }

</bundles_post_ra>
